<compile_context>
chip_gen: v7x
topology: tpu7x:2x2x1
jax: 0.10.0
libtpu: 0.0.40
codegen_flags: <defaults>
</compile_context>

<pallas_src>
import jax
import jax.numpy as jnp
from jax.experimental import pallas as pl
from jax.experimental.pallas import tpu as pltpu


# --------------------------------------------------------------------------------------
# Kernels
# --------------------------------------------------------------------------------------
def _pool_kernel(emb_ref, mask_ref, h_ref):
    # emb_ref:  (1, L, H)  token embeddings for one batch element (native storage dtype)
    # mask_ref: (1, 1, L)  lane-dense attention-mask row (float32)
    # h_ref:    (1, 1, H)  pooled query state (float32)
    emb = emb_ref[0]                                            # [L, H]
    mask_f32 = mask_ref[0]                                      # [1, L] f32
    # sum(tokens * mask, dim=1) as a [1,L]@[L,H] MXU matmul; mask is 0/1 so casting it
    # to the embedding dtype is exact and keeps bf16 embeddings on the native MXU path.
    summed = jnp.dot(mask_f32.astype(emb.dtype), emb,
                     preferred_element_type=jnp.float32)        # [1, H] f32
    # torch.clamp(mask.sum(1), min=1e-9)
    denom = jnp.maximum(jnp.sum(mask_f32, axis=-1, keepdims=True),
                        jnp.float32(1e-9))                      # [1, 1]
    h_ref[0] = summed * pl.reciprocal(denom, approx=False)      # [1, H]


def _scores_kernel(h_ref, corpus_ref, out_ref):
    # h_ref:      (1, 1, H)  f32 pooled state for this batch element (n-invariant block)
    # corpus_ref: (1, H, TN) pre-transposed corpus tile (native storage dtype)
    # out_ref:    (1, 1, TN) f32 lane-dense scores tile
    corpus_t = corpus_ref[0]                                    # [H, TN]
    # Cast the tiny [1,H] vector down to the corpus dtype (instead of letting JAX
    # promote the whole H x TN tile to f32 every step); accumulate in f32 on the MXU.
    hv = h_ref[0].astype(corpus_t.dtype)                        # [1, H]
    out_ref[0] = jnp.dot(hv, corpus_t,
                         preferred_element_type=jnp.float32).astype(out_ref.dtype)


# --------------------------------------------------------------------------------------
# Tiling / corpus preparation (do ONCE per corpus, cache the result)
# --------------------------------------------------------------------------------------
def _pick_tile(n, h, dtype, *, vmem_budget_bytes=24 << 20, max_tile=None):
    """Lane-aligned tile along N.  Big tiles amortize the ~0.35us per-grid-step
    overhead on this HBM-bound kernel; shrink only if the double-buffered corpus tile
    would blow the VMEM budget (kept ~24 MiB so it also fits v7x's 64 MiB VMEM)."""
    dsize = jnp.dtype(dtype).itemsize
    target = 8192 if dsize <= 2 else 4096
    if max_tile is not None:
        target = min(target, max_tile)
    n128 = ((n + 127) // 128) * 128
    tn = max(128, (min(target, n128) // 128) * 128)
    while tn > 128 and 2 * h * tn * dsize > vmem_budget_bytes:
        tn = max(128, ((tn // 2) // 128) * 128)
    n_pad = ((n + tn - 1) // tn) * tn          # pad N up to a multiple of tn
    return tn, n_pad


def prepare_corpus(corpuses, *, corpus_dtype=None, max_tile_n=None,
                   vmem_budget_bytes=24 << 20):
    """One-time corpus preparation: [B, N, H] -> lane-dense [B, H, N_pad].

    The transpose/pad is itself a full HBM read+write of the corpus, so it must NOT be
    paid per query batch.  Call this once per corpus (it is static for a Searcher) and
    reuse the result with searcher_forward_prepared().

    corpus_dtype=jnp.bfloat16 halves HBM traffic on the dominant stream (recommended,
    especially on v5e).  Returns (corpus_t, n, tn).
    """
    B, N, H = corpuses.shape
    if corpus_dtype is not None:
        corpuses = corpuses.astype(corpus_dtype)
    tn, n_pad = _pick_tile(N, H, corpuses.dtype,
                           vmem_budget_bytes=vmem_budget_bytes, max_tile=max_tile_n)
    corpus_t = jnp.swapaxes(corpuses, 1, 2)                     # [B, H, N]
    if n_pad != N:
        corpus_t = jnp.pad(corpus_t, ((0, 0), (0, 0), (0, n_pad - N)))
    return corpus_t, N, tn


# --------------------------------------------------------------------------------------
# Forward
# --------------------------------------------------------------------------------------
def searcher_forward_prepared(token_embeddings, attention_mask, corpus_t, n, tn):
    """Pallas implementation of Searcher.forward's tensor path (cached-corpus entry).

    Args:
      token_embeddings: [B, L, H] float32/bf16 (encoder last_hidden_state)
      attention_mask:   [B, L]    int/float mask
      corpus_t:         [B, H, N_pad] prepared corpus (from prepare_corpus)
      n, tn:            true corpus length and N-tile size (from prepare_corpus)

    Returns:
      [B, N] float32 score matrix (row i == the torch module's preds[i]).
    """
    B, L, H = token_embeddings.shape
    n_pad = corpus_t.shape[-1]

    # ---- mean pooling: h[b] = (mask @ emb) / clamp(sum(mask), 1e-9) ----
    mask_row = attention_mask.astype(jnp.float32).reshape(B, 1, L)
    h = pl.pallas_call(
        _pool_kernel,
        out_shape=jax.ShapeDtypeStruct((B, 1, H), jnp.float32),
        grid_spec=pltpu.PrefetchScalarGridSpec(
            num_scalar_prefetch=0,
            grid=(B,),
            in_specs=[
                pl.BlockSpec((1, L, H), lambda b: (b, 0, 0)),
                pl.BlockSpec((1, 1, L), lambda b: (b, 0, 0)),
            ],
            out_specs=pl.BlockSpec((1, 1, H), lambda b: (b, 0, 0)),
        ),
        compiler_params=pltpu.CompilerParams(dimension_semantics=("parallel",)),
    )(token_embeddings, mask_row)

    # ---- scores: stream the corpus, [1,H] @ [H,tn] -> lane-dense [1,tn] ----
    dsize = corpus_t.dtype.itemsize
    vmem_needed = 2 * H * tn * dsize + 2 * tn * 4 + 2 * H * 4 + (4 << 20)
    vmem_limit = min(max(vmem_needed, 32 << 20), 48 << 20)   # >v5e default, <v7x physical

    grid = (B, n_pad // tn)
    # NOTE: if the corpus were shared across batch elements, collapsing the per-b
    # corpus dim into a single [B,H]@[H,tn] stream would read it once instead of B
    # times; the torch module uses per-batch corpuses, so we keep them separate.
    out = pl.pallas_call(
        _scores_kernel,
        out_shape=jax.ShapeDtypeStruct((B, 1, n_pad), jnp.float32),
        grid_spec=pltpu.PrefetchScalarGridSpec(
            num_scalar_prefetch=0,
            grid=grid,
            in_specs=[
                # h is n-invariant -> fetched once per batch element.
                pl.BlockSpec((1, 1, H), lambda b, nt: (b, 0, 0)),
                # corpus streams tile-by-tile along N (Pallas double-buffers).
                pl.BlockSpec((1, H, tn), lambda b, nt: (b, 0, nt)),
            ],
            out_specs=pl.BlockSpec((1, 1, tn), lambda b, nt: (b, 0, nt)),
        ),
        compiler_params=pltpu.CompilerParams(
            # No scratch carry: both axes are parallel (v7x megacore can split the
            # N axis even for a single-query batch).
            dimension_semantics=("parallel", "parallel"),
            vmem_limit_bytes=vmem_limit,
        ),
    )(h, corpus_t)

    return out[:, 0, :n]                                        # [B, N]


def searcher_forward(token_embeddings, attention_mask, corpuses, *,
                     corpus_dtype=None, max_tile_n=None):
    """Convenience entry taking a raw [B, N, H] corpus.  For repeated queries against
    the same corpus, call prepare_corpus() once and use searcher_forward_prepared()
    (the transpose/pad here is HBM-bound and should not be paid per call)."""
    prep = prepare_corpus(corpuses, corpus_dtype=corpus_dtype, max_tile_n=max_tile_n)
    return searcher_forward_prepared(token_embeddings, attention_mask, *prep)


# --------------------------------------------------------------------------------------
# Reference + self-test
# --------------------------------------------------------------------------------------
def _reference_forward(token_embeddings, attention_mask, corpuses):
    """Pure-JAX reference matching the torch code."""
    mask = attention_mask.astype(jnp.float32)[..., None]                    # [B, L, 1]
    summed = jnp.sum(token_embeddings.astype(jnp.float32) * mask, axis=1)   # [B, H]
    denom = jnp.maximum(jnp.sum(mask, axis=1), 1e-9)                        # [B, 1]
    h = summed / denom                                                      # [B, H]
    return [corpuses[i].astype(jnp.float32) @ h[i]
            for i in range(token_embeddings.shape[0])]


if __name__ == "__main__":
    B, L, H, N = 2, 8, 128, 16  # small MiniLM-like shapes (hidden dim lane-aligned)

    key = jax.random.PRNGKey(0)
    k_emb, k_corp = jax.random.split(key)

    token_embeddings = jax.random.normal(k_emb, (B, L, H), dtype=jnp.float32)
    # deterministic mask: first row has trailing padding, second is fully attended
    attention_mask = jnp.array(
        [[1, 1, 1, 1, 1, 0, 0, 0],
         [1, 1, 1, 1, 1, 1, 1, 1]], dtype=jnp.int32)
    corpuses = jax.random.normal(k_corp, (B, N, H), dtype=jnp.float32)

    refs = _reference_forward(token_embeddings, attention_mask, corpuses)

    # f32 corpus path (prepared once, reused per query batch).
    prep_f32 = prepare_corpus(corpuses)
    preds = searcher_forward_prepared(token_embeddings, attention_mask, *prep_f32)
    preds = jax.block_until_ready(preds)                                    # [B, N]
    assert preds.shape == (B, N)
    for i in range(B):
        assert jnp.allclose(preds[i], refs[i], atol=1e-4, rtol=1e-4), (preds[i], refs[i])

    # bf16-stored corpus path (halves HBM traffic on the dominant stream).
    prep_bf16 = prepare_corpus(corpuses, corpus_dtype=jnp.bfloat16)
    preds_bf16 = jax.block_until_ready(
        searcher_forward_prepared(token_embeddings, attention_mask, *prep_bf16))
    assert preds_bf16.shape == (B, N)
    for i in range(B):
        assert jnp.allclose(preds_bf16[i], refs[i], atol=0.5, rtol=0.05)

    print("KERNEL_OK")
</pallas_src>

<mosaic_0001>
module attributes {stable_mosaic.version = 11 : i64} {
  func.func @_pool_kernel(%arg0: i32, %arg1: memref<1x8x128xf32, #tpu.memory_space<vmem>>, %arg2: memref<1x1x8xf32, #tpu.memory_space<vmem>>, %arg3: memref<1x1x128xf32, #tpu.memory_space<vmem>>) attributes {dimension_semantics = [#tpu.dimension_semantics<parallel>], iteration_bounds = array<i64: 2>, scalar_prefetch = 0 : i64, scratch_operands = 0 : i64, tpu.core_type = #tpu.core_type<tc>, window_params = [{transform_indices = @transform_0, window_bounds = array<i64: 1, 8, 128>}, {transform_indices = @transform_1, window_bounds = array<i64: 1, 1, 8>}, {transform_indices = @transform_2, window_bounds = array<i64: 1, 1, 128>}]} {
    %c0 = arith.constant 0 : index
    %c0_0 = arith.constant 0 : index
    %c0_1 = arith.constant 0 : index
    %0 = vector.load %arg1[%c0, %c0_0, %c0_1] : memref<1x8x128xf32, #tpu.memory_space<vmem>>, vector<1x8x128xf32>
    %1 = vector.shape_cast %0 : vector<1x8x128xf32> to vector<8x128xf32>
    %c0_2 = arith.constant 0 : index
    %c0_3 = arith.constant 0 : index
    %c0_4 = arith.constant 0 : index
    %2 = vector.load %arg2[%c0_2, %c0_3, %c0_4] : memref<1x1x8xf32, #tpu.memory_space<vmem>>, vector<1x1x8xf32>
    %3 = vector.shape_cast %2 : vector<1x1x8xf32> to vector<1x8xf32>
    %cst = arith.constant dense<0.000000e+00> : vector<1x128xf32>
    %4 = tpu.matmul %3, %1, %cst {dimension_numbers = #tpu.dot_dimension_numbers<[1], [0], [0], [1], [0, 0, 1, 1], [], []>} : vector<1x8xf32>, vector<8x128xf32>, vector<1x128xf32> -> vector<1x128xf32>
    %cst_5 = arith.constant dense<0.000000e+00> : vector<1xf32>
    %5 = vector.multi_reduction <add>, %3, %cst_5 [1] : vector<1x8xf32> to vector<1xf32>
    %6 = vector.shape_cast %5 : vector<1xf32> to vector<1x1xf32>
    %cst_6 = arith.constant 9.99999971E-10 : f32
    %7 = vector.broadcast %cst_6 : f32 to vector<1x1xf32>
    %8 = arith.maximumf %6, %7 : vector<1x1xf32>
    %9 = tpu.reciprocal %8 : vector<1x1xf32> -> vector<1x1xf32>
    %10 = vector.broadcast %9 : vector<1x1xf32> to vector<1x128xf32>
    %11 = arith.mulf %4, %10 : vector<1x128xf32>
    %c0_7 = arith.constant 0 : index
    %c0_8 = arith.constant 0 : index
    %c0_9 = arith.constant 0 : index
    %12 = vector.load %arg3[%c0_7, %c0_8, %c0_9] : memref<1x1x128xf32, #tpu.memory_space<vmem>>, vector<1x1x128xf32>
    %13 = vector.shape_cast %12 : vector<1x1x128xf32> to vector<1x128xf32>
    %14 = vector.shape_cast %11 : vector<1x128xf32> to vector<1x1x128xf32>
    tpu.vector_store %arg3[%c0_7, %c0_8, %c0_9], %14 {strides = array<i32>} : memref<1x1x128xf32, #tpu.memory_space<vmem>>, vector<1x1x128xf32>,
    return
  }
  func.func @transform_0(%arg0: i32) -> (i32, i32, i32) {
    %c0_i32 = arith.constant 0 : i32
    %c0_i32_0 = arith.constant 0 : i32
    %c0_i32_1 = arith.constant 0 : i32
    return %arg0, %c0_i32, %c0_i32_0 : i32, i32, i32
  }
  func.func @transform_1(%arg0: i32) -> (i32, i32, i32) {
    %c0_i32 = arith.constant 0 : i32
    %c0_i32_0 = arith.constant 0 : i32
    %c0_i32_1 = arith.constant 0 : i32
    return %arg0, %c0_i32, %c0_i32_0 : i32, i32, i32
  }
  func.func @transform_2(%arg0: i32) -> (i32, i32, i32) {
    %c0_i32 = arith.constant 0 : i32
    %c0_i32_0 = arith.constant 0 : i32
    %c0_i32_1 = arith.constant 0 : i32
    return %arg0, %c0_i32, %c0_i32_0 : i32, i32, i32
  }
}

</mosaic_0001>

<bundles_post_ra>
// kernel: tpu_custom_call.1
= control target key start
LH: loop header
LB: loop body
LE: loop exit
PB: predicated region body
PF: predicated region fallthrough
CT: control target
= control target key end

     0   :  { %7 = vsyncpa [#allocation3], 0  ;;  %s696_s0 = inlined_call_operand.hbm [shape: f32[2,8,128], index: 0, kind: input, shape index: {}]   ;;  %s697_s1 = inlined_call_operand.vmem [shape: f32[2,1,8], index: 1, kind: input, shape index: {}]   ;;  %s698_s2 = inlined_call_operand.hbm [shape: f32[2,1,128], index: 2, kind: output, shape index: {}]  }
   0x1   :  { %9 = vsyncpa [#allocation3 + $0x1], 0 }
   0x2   :  { %10 = vsyncpa [#allocation4], 0 }
   0x3   :  { %12 = vsyncpa [#allocation4 + $0x1], 0  ;;  %s529_s9 = smov 0   ;;  %s531_s10 = smov 0  }
   0x4   :  { %s533_s11 = smov 0   ;;  %s535_s12 = smov 0  }
   0x5 LB: > { %s550_s13 = sadd.s32 4294967295, %s508_s12   ;;  %s344_s14 = sadd.s32 4294967294, %s508_s12   ;;  %s508_s12 = sphi %s535_s12, %s713_s12   ;;  %s504_s11 = sphi %s533_s11, %s712_s11   ;;  %s500_s10 = sphi %s531_s10, %s711_s10   ;;  %s496_s9 = sphi %s529_s9, %s710_s9  }
   0x6   : > { %s554_s15 = sadd.s32 1, %s508_s12   ;;  %s25_s16 = sadd.s32 1, %s504_s11 }
   0x7   : > { %s22_s17 = ssub.s32 %s508_s12, %s554_s15  ;;  %p32_p0 = scmp.ne.s32.totalorder %s504_s11, %s500_s10 }
   0x8   : > { %p23_p1 = scmp.eq.s32.totalorder %s22_s17, 0  ;;  %p33_p2 = scmp.eq.s32.totalorder %s508_s12, 0 }
   0x9   : > { %p38_p3 = scmp.ne.s32.totalorder %s500_s10, %s496_s9  ;;  %p39_p4 = scmp.eq.s32.totalorder %s550_s13, 0 }
   0xa   : > { %s566_s18 = scalar_select %p23_p1, %s504_s11, %s25_s16  }
   0xb   : > { %p568_p5 = por %p33_p2, %p32_p0  ;;  %p572_p6 = por %p39_p4, %p38_p3 }
   0xc   : > { %p88_p7 = scmp.eq.s32.totalorder %s550_s13, 1  ;;  %p94_p8 = scmp.eq.s32.totalorder %s344_s14, 1 }
   0xd   : > { %p374_p10 = scmp.lt.s32.totalorder %s508_s12, 2  ;;  %s114_s23 = sand.u32 1, %s504_s11  }
   0xe   : > { %p579_p11 = por %p88_p7, %p32_p0  ;;  %p583_p12 = por %p94_p8, %p38_p3 }
   0xf   : > { %s348_s24 = sshll.u32 %s508_s12, 7  ;;  %s347_s25 = sshll.u32 %s114_s23, 3 }
  0x10   : > { %s702_s21 = scalar_select %p579_p11, 1, 0 }
  0x11   : > { %s703_s22 = scalar_select %p583_p12, 1, 0 }
  0x12   : > { %s592_s28 = scalar_lea.hbm %s696_s0, %s348_s24  ;;  %s118_s29 = scalar_lea.vmem [#allocation2], %s347_s25 }
  0x13   : > { %s125_s30 = sshll.u32 %s118_s29, 4  ;;  %p596_p13 = pnand %p374_p10, %p568_p5  ;;  %s600_s30 = int_to_ptr.vmem [resolvable:$true] %s125_s30 }
  0x14   : > { %s115_s4 = scalar_lea.sflag [#allocation3], %s114_s23  ;;  %s412_s5 = scalar_lea.hbm %s592_s28, 128 }
  0x15   : > { %p413_p2 = scmp.ne.s32.totalorder %s592_s28, %s412_s5  ;;  %p414_p3 = pneg %p596_p13 }
  0x16   : > { %s417_s8 = scalar_lea.hbm %s696_s0, 256  ;;  %p418_p5 = scmp.lt.u32.totalorder %s592_s28, %s696_s0 }
  0x17   : > { %p415_p4 = pnand %p414_p3, %p413_p2  ;;  %p419_p8 = scmp.lt.u32.totalorder %s417_s8, %s412_s5 }
  0x18   : > { %p421_p9 = scmp.lt.u32.totalorder %s412_s5, %s592_s28 }
  0x19   : > { %p416_p7 = pneg %p415_p4  ;;  %p420_p10 = por %p419_p8, %p418_p5 }
  0x1b   : > { %p422_p0 = por %p421_p9, %p420_p10 }
  0x1d   : > { %p423_p1 = pnand %p422_p0, %p416_p7 }
  0x1f   : > { %426 = shalt.err (!%p423_p1)
}
  0x20   : > { %s427_s17 = scalar_lea.vmem %s600_s30, 128  ;;  %s510_s19 = smov [#allocation2]  }
  0x21   : > { %p428_p2 = scmp.ne.s32.totalorder %s600_s30, %s427_s17  ;;  %s432_s23 = sshll.u32 %s510_s19, 4  ;;  %s433_s23 = int_to_ptr.vmem [resolvable:$false] %s432_s23 }
  0x22   : > { %s434_s24 = scalar_lea.vmem %s433_s23, 256  ;;  %p435_p11 = scmp.lt.s32.totalorder %s600_s30, %s433_s23 }
  0x23   : > { %p430_p4 = pnand %p428_p2, %p414_p3  ;;  %p436_p5 = scmp.lt.s32.totalorder %s434_s24, %s427_s17 }
  0x25   : > { %p431_p12 = pneg %p430_p4  ;;  %p437_p8 = por %p436_p5, %p435_p11 }
  0x27   : > { %p438_p9 = pnand %p437_p8, %p431_p12 }
  0x29   : > { %441 = shalt.err (!%p438_p9)
}
  0x2a   : > { %369 = dma.hbm_to_vmem [thread:$0]  (!%p596_p13), %s592_s28, 128, %s600_s30, %s115_s4  }
  0x2b   : > { %p705_p0 = scmp.lt.s32.totalorder %s508_s12, 3  ;;  %p706_p1 = scmp.ge.s32.totalorder %s508_s12, 1 }
  0x2d   : > { %p137_p3 = pnand %p706_p1, %p705_p0 }
  0x2e   : > { %s634_s25 = sand.u32 (!%p137_p3), 1, %s500_s10  }
  0x2f   : > { %140 = sbr.rel (%p137_p3) target bundleno = 289 (0x121), region = 28  ;;  %s350_s26 = sshll.u32 (!%p137_p3), %s634_s25, 3 }
  0x30   : > { %s143_s27 = scalar_lea.sflag (!%p137_p3), [#allocation3], %s634_s25  ;;  %s146_s29 = scalar_lea.vmem (!%p137_p3), [#allocation2], %s350_s26 }
  0x36   : > { %487 = dma.done.wait (%p572_p6), %s143_s27, 128  }
  0x37   : > { %489 = vsyncadd (%p572_p6), %s143_s27, 4294967168  ;;  %p169_p11 = scmp.lt.s32.totalorder %s550_s13, 1  ;;  %v511_v0 = vmov 0.0   ;;  %vm512_vm0 = vmmov 0   ;;  %vm248_vm1 = vcmask 57344   ;;  %vm174_vm2 = vcmask 64512  }
  0x38   : > { %357 = vmatprep.subr.mxu0 %v511_v0  ;;  %359 = vmatprep.mubr.msk.f32.mxu0 %vm512_vm0, %v511_v0  ;;  %v172_v1 = vld [vmem:[%s146_s29] sm:$0xff]  ;;  %s352_s20 = sshll.u32 %s550_s13, 4  ;;  %s168_s5 = scalar_lea.vmem [#allocation5], %s634_s25 }
  0x39   : > { %s170_s28 = scalar_select %p169_p11, %s550_s13, 1  ;;  %358 = vmatpush3.msra.mxu0 %v172_v1 }
  0x3a   : > { %s269_s6 = sshll.u32 %s168_s5, 4  ;;  %s652_s14 = scalar_lea.hbm %s698_s2, %s352_s20  ;;  %s654_s6 = int_to_ptr.vmem [resolvable:$true] %s269_s6 }
  0x3b   : > { %s171_s4 = scalar_lea.vmem %s697_s1, %s170_s28  ;;  %s257_s16 = scalar_lea.sflag [#allocation4], %s634_s25 }
  0x3c   : > { %v173_v2 = vld [vmem:[%s171_s4] sm:$0x1]  ;;  %s442_s17 = scalar_lea.vmem %s654_s6, 16  ;;  %p707_p12 = scmp.ne.s32.totalorder %s702_s21, 0 }
  0x3d   : > { %v249_v3 = vsel %vm248_vm1, %v173_v2, 0.0  ;;  %360 = vmatmul.mubr.msk.f32.vlgmr.msra.gmra.mrb[0].mxu0 %vm174_vm2, %v173_v2  ;;  %p443_p6 = scmp.ne.s32.totalorder %s654_s6, %s442_s17  ;;  %s513_s13 = smov [#allocation5]  }
  0x3e   : > { %250 = vadd.xlane.f32.xlu0 %v249_v3  ;;  %s446_s19 = sshll.u32 %s513_s13, 4  ;;  %s447_s19 = int_to_ptr.vmem [resolvable:$false] %s446_s19 }
  0x3f   : > { %p444_p13 = pnand %p443_p6, %p707_p12  ;;  %s448_s23 = scalar_lea.vmem %s447_s19, 32 }
  0x40   : > { %p449_p10 = scmp.lt.s32.totalorder %s654_s6, %s447_s19  ;;  %p450_p2 = scmp.lt.s32.totalorder %s448_s23, %s442_s17 }
  0x41   : > { %p445_p7 = pneg %p444_p13 }
  0x42   : > { %p451_p4 = por %p450_p2, %p449_p10 }
  0x44   : > { %p452_p5 = pnand %p451_p4, %p445_p7 }
  0xcb   : > { %v251_v4 = vpop.xlane.xlu0 %250 }
  0xcc   : > { %v252_v5 = vmax.f32 %v251_v4, 1e-09 }
  0xce   : > { %410 = vrcp.f32 %v252_v5 }
  0xd8   : > { %v411_v6 = vpop.eup %410 }
 0x110   : > { %v244_v7 = vpop.f32.mrb[0].mxu0 }
 0x111   : > { %v254_v8 = vmul.f32 %v411_v6, %v244_v7  ;;  %v361_v9 = vpop.f32.mrb[1].mxu0 }
 0x113   : > { %255 = vst [vmem:[%s168_s5] sm:$0x1] %v254_v8 }
 0x114   : > { %455 = shalt.err (!%p452_p5)
}
 0x115   : > { %s456_s24 = scalar_lea.hbm %s652_s14, 16  ;;  %s460_s27 = scalar_lea.hbm %s698_s2, 32 }
 0x116   : > { %p457_p8 = scmp.ne.s32.totalorder %s652_s14, %s456_s24  ;;  %p461_p1 = scmp.lt.u32.totalorder %s652_s14, %s698_s2 }
 0x117   : > { %p462_p3 = scmp.lt.u32.totalorder %s460_s27, %s456_s24  ;;  %p464_p6 = scmp.lt.u32.totalorder %s456_s24, %s652_s14 }
 0x118   : > { %p458_p9 = pnand %p457_p8, %p707_p12 }
 0x119   : > { %p463_p11 = por %p462_p3, %p461_p1 }
 0x11a   : > { %p459_p0 = pneg %p458_p9 }
 0x11b   : > { %p465_p13 = por %p464_p6, %p463_p11 }
 0x11d   : > { %p466_p7 = pnand %p465_p13, %p459_p0 }
 0x11f   : > { %469 = shalt.err (!%p466_p7)
}
 0x120   : > { %364 = dma.vmem_to_hbm [thread:$0]  (%p707_p12), %s654_s6, 16, %s652_s14, %s257_s16  }
 0x121 PF: > { %s281_s30 = sand.u32 1, %s496_s9   ;;  %p708_p10 = scmp.ne.s32.totalorder %s703_s22, 0 }
 0x122   : > { %p709_p2 = scmp.ge.s32.totalorder %s508_s12, 2  ;;  %s282_s3 = scalar_lea.sflag [#allocation4], %s281_s30 }
 0x124   : > { %p371_p4 = pnand %p709_p2, %p708_p10 }
 0x126   : > { %491 = dma.done.wait (!%p371_p4), %s282_s3, 16  }
 0x127   : > { %493 = vsyncadd (!%p371_p4), %s282_s3, 4294967280  ;;  %p15_p5 = scmp.ge.s32.totalorder %s554_s15, 4   ;;  %s710_s9 = smov %s500_s10 }
 0x128   : > { %s711_s10 = smov %s504_s11  ;;  %s712_s11 = smov %s566_s18 }
 0x129   : > { %s713_s12 = smov %s554_s15  ;;  %17 = sbr.rel (!%p15_p5) target bundleno = 5 (0x5), region = 76 }
 0x130   :  { %286 = vsyncpa [#allocation3], 1 }
 0x131   :  { %288 = vsyncpa [#allocation3 + $0x1], 1 }
 0x132   :  { %289 = vsyncpa [#allocation4], 1 }
 0x133   :  { %291 = vsyncpa [#allocation4 + $0x1], 1 }

</bundles_post_ra>
